<compile_context>
chip_gen: v7x
topology: tpu7x:2x2x1
jax: 0.10.0
libtpu: 0.0.40
codegen_flags: <defaults>
</compile_context>

<pallas_src>
import functools

import jax
import jax.numpy as jnp
from jax import lax
from jax.experimental import pallas as pl
from jax.experimental.pallas import tpu as pltpu

# Module hyper-parameters (stand-ins for the env vars in the PyTorch module).
EMBEDDING_DIMS = 32
NUM_HEADS = 4
ATTENTION_DROPOUT = 0
LN_EPS = 1e-5


def _mhsa_kernel(x_ref, w_in_ref, b_in_ref, wo_ref, bo_ref, o_ref, *,
                 num_heads: int, head_dim: int, eps: float, mm_dtype):
    """One batch block: LayerNorm(stats only) -> fused QKV -> per-head attn -> out proj."""
    bb, S, E = x_ref.shape
    H, D = num_heads, head_dim

    # Parameters: loaded once per grid step, shared by all batch rows in the block.
    w_in = w_in_ref[...].astype(mm_dtype)        # (E, 3E)  gamma + 1/sqrt(D) folded in
    b_in = b_in_ref[0]                           # (3E,)    beta + 1/sqrt(D) folded in
    wo = wo_ref[...].astype(mm_dtype)            # (E, E)   out_proj.weight.T
    bo = bo_ref[0]                               # (E,)
    # Hoist per-head out-proj row blocks out of the (unrolled) batch loop.
    wo_heads = [wo[h * D:(h + 1) * D, :] for h in range(H)]

    for b in range(bb):                          # small static unroll over batch rows
        x = x_ref[b].astype(jnp.float32)         # (S, E)

        # ---- LayerNorm statistics only (affine folded into w_in / b_in) ----
        mu = jnp.mean(x, axis=-1, keepdims=True)
        var = jnp.mean(jnp.square(x - mu), axis=-1, keepdims=True)
        z = (x - mu) * lax.rsqrt(var + eps)      # (S, E)

        # ---- fused, lane-dense QKV projection: one (S,E)@(E,3E) MXU matmul ----
        qkv = jnp.dot(z.astype(mm_dtype), w_in,
                      preferred_element_type=jnp.float32) + b_in    # (S, 3E)

        # ---- per-head scaled dot-product attention (static unroll over H) ----
        acc = None
        for h in range(H):
            q = qkv[:, h * D:(h + 1) * D]                    # (S, D), already scaled
            k = qkv[:, E + h * D:E + (h + 1) * D]            # (S, D)
            v = qkv[:, 2 * E + h * D:2 * E + (h + 1) * D]    # (S, D)

            # scores: contract head dim of q and k directly (no explicit transpose)
            s = lax.dot_general(q.astype(mm_dtype), k.astype(mm_dtype),
                                (((1,), (1,)), ((), ())),
                                preferred_element_type=jnp.float32)   # (S, S)
            s = s - jnp.max(s, axis=-1, keepdims=True)
            p = jnp.exp(s)
            # EUP approx reciprocal (otherwise-idle slot); applied to the smaller
            # (S, D) context rather than the (S, S) probabilities.
            inv_l = pl.reciprocal(jnp.sum(p, axis=-1, keepdims=True), approx=True)
            ctx = jnp.dot(p.astype(mm_dtype), v.astype(mm_dtype),
                          preferred_element_type=jnp.float32) * inv_l  # (S, D)

            # out_proj contribution of this head (head merge == sum of (S,E) blocks)
            head_out = jnp.dot(ctx.astype(mm_dtype), wo_heads[h],
                               preferred_element_type=jnp.float32)     # (S, E)
            acc = head_out if acc is None else acc + head_out

        o_ref[b] = (acc + bo).astype(o_ref.dtype)


def vit_mhsa_block(x, gamma, beta, wqkv, bqkv, wo, bo, *,
                   num_heads=NUM_HEADS, eps=LN_EPS, use_bf16_matmul=False):
    B, S, E = x.shape
    H = num_heads
    assert E % H == 0, "embedding_dims must be divisible by num_heads"
    D = E // H
    scale = 1.0 / float(D) ** 0.5

    # ---- trace-time weight plumbing (free) ----
    # qkv = (z*gamma + beta) @ Wqkv.T + bqkv
    #     = z @ (gamma[:,None] * Wqkv.T) + (beta @ Wqkv.T + bqkv)
    # and the 1/sqrt(D) softmax scale is folded into the Q columns.
    gamma_v = gamma.reshape(E).astype(jnp.float32)
    beta_v = beta.reshape(1, E).astype(jnp.float32)
    w_t = wqkv.T.astype(jnp.float32)                       # (E, 3E)
    b_t = bqkv.reshape(1, 3 * E).astype(jnp.float32)       # (1, 3E)

    w_g = w_t * gamma_v[:, None]                           # fold LN gamma
    b_g = b_t + beta_v @ w_t                               # fold LN beta
    col_scale = jnp.concatenate(
        [jnp.full((E,), scale, jnp.float32), jnp.ones((2 * E,), jnp.float32)])
    w_in = w_g * col_scale[None, :]                        # fold 1/sqrt(D) into Q
    b_in = b_g * col_scale[None, :]
    wo_t = wo.T.astype(jnp.float32)                        # (E, E)
    bo_2d = bo.reshape(1, E).astype(jnp.float32)

    # ---- batch blocking: at most 2 "parallel" grid blocks (keeps both v7x
    #      TensorCores busy), remaining batch statically folded into each block
    #      to amortise the per-grid-step overhead. ----
    if B >= 2 and B % 2 == 0 and B // 2 <= 8:
        num_blocks = 2
    else:
        num_blocks = max(B, 1)
    bb = B // num_blocks
    assert num_blocks * bb == B

    mm_dtype = jnp.bfloat16 if use_bf16_matmul else jnp.float32
    kernel = functools.partial(_mhsa_kernel, num_heads=H, head_dim=D,
                               eps=eps, mm_dtype=mm_dtype)

    return pl.pallas_call(
        kernel,
        out_shape=jax.ShapeDtypeStruct((B, S, E), x.dtype),
        grid=(num_blocks,),
        in_specs=[
            pl.BlockSpec((bb, S, E), lambda i: (i, 0, 0)),     # x
            pl.BlockSpec((E, 3 * E), lambda i: (0, 0)),        # fused in_proj weight
            pl.BlockSpec((1, 3 * E), lambda i: (0, 0)),        # fused in_proj bias
            pl.BlockSpec((E, E), lambda i: (0, 0)),            # out_proj weight (T)
            pl.BlockSpec((1, E), lambda i: (0, 0)),            # out_proj bias
        ],
        out_specs=pl.BlockSpec((bb, S, E), lambda i: (i, 0, 0)),
        compiler_params=pltpu.CompilerParams(
            dimension_semantics=("parallel",)),
    )(x, w_in, b_in, wo_t, bo_2d)


def _reference(x, gamma, beta, wqkv, bqkv, wo, bo, num_heads=NUM_HEADS):
    """Pure-JAX reference matching nn.LayerNorm + nn.MultiheadAttention forward."""
    B, S, E = x.shape
    D = E // num_heads
    mu = jnp.mean(x, axis=-1, keepdims=True)
    var = jnp.mean((x - mu) ** 2, axis=-1, keepdims=True)
    xn = (x - mu) / jnp.sqrt(var + LN_EPS) * gamma[0] + beta[0]
    qkv = xn @ wqkv.T + bqkv[0]
    q, k, v = jnp.split(qkv, 3, axis=-1)

    def heads(t):  # (B,S,E) -> (B,H,S,D)
        return t.reshape(B, S, num_heads, D).transpose(0, 2, 1, 3)

    qh, kh, vh = heads(q), heads(k), heads(v)
    s = jnp.einsum("bhqd,bhkd->bhqk", qh, kh) / jnp.sqrt(jnp.float32(D))
    p = jax.nn.softmax(s, axis=-1)
    o = jnp.einsum("bhqk,bhkd->bhqd", p, vh).transpose(0, 2, 1, 3).reshape(B, S, E)
    return o @ wo.T + bo[0]


if __name__ == "__main__":
    B, S, E, H = 2, 8, EMBEDDING_DIMS, NUM_HEADS

    key = jax.random.PRNGKey(0)
    kx, kw1, kb1, kw2, kb2, kg, kb = jax.random.split(key, 7)

    x = jax.random.normal(kx, (B, S, E), dtype=jnp.float32)

    # Deterministic parameter init (synthetic; shapes match nn.LayerNorm +
    # nn.MultiheadAttention in_proj/out_proj parameters).
    gamma = 1.0 + 0.1 * jax.random.normal(kg, (1, E), dtype=jnp.float32)
    beta = 0.1 * jax.random.normal(kb, (1, E), dtype=jnp.float32)
    wqkv = 0.1 * jax.random.normal(kw1, (3 * E, E), dtype=jnp.float32)
    bqkv = 0.1 * jax.random.normal(kb1, (1, 3 * E), dtype=jnp.float32)
    wo = 0.1 * jax.random.normal(kw2, (E, E), dtype=jnp.float32)
    bo = 0.1 * jax.random.normal(kb2, (1, E), dtype=jnp.float32)

    out = vit_mhsa_block(x, gamma, beta, wqkv, bqkv, wo, bo)
    out = jax.block_until_ready(out)

    ref = _reference(x, gamma, beta, wqkv, bqkv, wo, bo)
    assert out.shape == (B, S, E)
    # Tolerance accounts for the EUP approximate reciprocal in the softmax
    # denominator (rel-err ~2^-12) plus the trace-time LN-affine folding.
    assert jnp.allclose(out, ref, atol=2e-3, rtol=2e-3), "mismatch vs reference"

    print("KERNEL_OK")
</pallas_src>

<mosaic_0001>
module attributes {stable_mosaic.version = 11 : i64} {
  func.func @_mhsa_kernel(%arg0: i32, %arg1: memref<1x8x32xf32, #tpu.memory_space<vmem>>, %arg2: memref<32x96xf32, #tpu.memory_space<vmem>>, %arg3: memref<1x96xf32, #tpu.memory_space<vmem>>, %arg4: memref<32x32xf32, #tpu.memory_space<vmem>>, %arg5: memref<1x32xf32, #tpu.memory_space<vmem>>, %arg6: memref<1x8x32xf32, #tpu.memory_space<vmem>>) attributes {dimension_semantics = [#tpu.dimension_semantics<parallel>], iteration_bounds = array<i64: 2>, scalar_prefetch = 0 : i64, scratch_operands = 0 : i64, tpu.core_type = #tpu.core_type<tc>, window_params = [{transform_indices = @transform_0, window_bounds = array<i64: 1, 8, 32>}, {pipeline_mode = #tpu.pipeline_mode<synchronous>, transform_indices = @transform_1, window_bounds = array<i64: 32, 96>}, {pipeline_mode = #tpu.pipeline_mode<synchronous>, transform_indices = @transform_2, window_bounds = array<i64: 1, 96>}, {pipeline_mode = #tpu.pipeline_mode<synchronous>, transform_indices = @transform_3, window_bounds = array<i64: 32, 32>}, {pipeline_mode = #tpu.pipeline_mode<synchronous>, transform_indices = @transform_4, window_bounds = array<i64: 1, 32>}, {transform_indices = @transform_5, window_bounds = array<i64: 1, 8, 32>}]} {
    %c0 = arith.constant 0 : index
    %c0_0 = arith.constant 0 : index
    %0 = vector.load %arg2[%c0, %c0_0] : memref<32x96xf32, #tpu.memory_space<vmem>>, vector<32x96xf32>
    %c0_1 = arith.constant 0 : index
    %c0_2 = arith.constant 0 : index
    %1 = vector.load %arg3[%c0_1, %c0_2] : memref<1x96xf32, #tpu.memory_space<vmem>>, vector<1x96xf32>
    %2 = vector.shape_cast %1 : vector<1x96xf32> to vector<96xf32>
    %c0_3 = arith.constant 0 : index
    %c0_4 = arith.constant 0 : index
    %3 = vector.load %arg4[%c0_3, %c0_4] : memref<32x32xf32, #tpu.memory_space<vmem>>, vector<32x32xf32>
    %c0_5 = arith.constant 0 : index
    %c0_6 = arith.constant 0 : index
    %4 = vector.load %arg5[%c0_5, %c0_6] : memref<1x32xf32, #tpu.memory_space<vmem>>, vector<1x32xf32>
    %5 = vector.shape_cast %4 : vector<1x32xf32> to vector<32xf32>
    %6 = vector.extract_strided_slice %3 {offsets = [0, 0], sizes = [8, 32], strides = [1, 1]} : vector<32x32xf32> to vector<8x32xf32>
    %7 = vector.extract_strided_slice %3 {offsets = [8, 0], sizes = [8, 32], strides = [1, 1]} : vector<32x32xf32> to vector<8x32xf32>
    %8 = vector.extract_strided_slice %3 {offsets = [16, 0], sizes = [8, 32], strides = [1, 1]} : vector<32x32xf32> to vector<8x32xf32>
    %9 = vector.extract_strided_slice %3 {offsets = [24, 0], sizes = [8, 32], strides = [1, 1]} : vector<32x32xf32> to vector<8x32xf32>
    %c0_7 = arith.constant 0 : index
    %c0_8 = arith.constant 0 : index
    %c0_9 = arith.constant 0 : index
    %10 = vector.load %arg1[%c0_7, %c0_8, %c0_9] : memref<1x8x32xf32, #tpu.memory_space<vmem>>, vector<1x8x32xf32>
    %11 = vector.shape_cast %10 : vector<1x8x32xf32> to vector<8x32xf32>
    %cst = arith.constant dense<0.000000e+00> : vector<8xf32>
    %12 = vector.multi_reduction <add>, %11, %cst [1] : vector<8x32xf32> to vector<8xf32>
    %13 = vector.shape_cast %12 : vector<8xf32> to vector<8x1xf32>
    %cst_10 = arith.constant 3.200000e+01 : f32
    %14 = vector.broadcast %cst_10 : f32 to vector<8x1xf32>
    %15 = arith.divf %13, %14 : vector<8x1xf32>
    %16 = vector.broadcast %15 : vector<8x1xf32> to vector<8x32xf32>
    %17 = arith.subf %11, %16 : vector<8x32xf32>
    %18 = arith.mulf %17, %17 : vector<8x32xf32>
    %cst_11 = arith.constant dense<0.000000e+00> : vector<8xf32>
    %19 = vector.multi_reduction <add>, %18, %cst_11 [1] : vector<8x32xf32> to vector<8xf32>
    %20 = vector.shape_cast %19 : vector<8xf32> to vector<8x1xf32>
    %cst_12 = arith.constant 3.200000e+01 : f32
    %21 = vector.broadcast %cst_12 : f32 to vector<8x1xf32>
    %22 = arith.divf %20, %21 : vector<8x1xf32>
    %23 = vector.broadcast %15 : vector<8x1xf32> to vector<8x32xf32>
    %24 = arith.subf %11, %23 : vector<8x32xf32>
    %cst_13 = arith.constant 9.99999974E-6 : f32
    %25 = vector.broadcast %cst_13 : f32 to vector<8x1xf32>
    %26 = arith.addf %22, %25 : vector<8x1xf32>
    %27 = math.rsqrt %26 : vector<8x1xf32>
    %28 = vector.broadcast %27 : vector<8x1xf32> to vector<8x32xf32>
    %29 = arith.mulf %24, %28 : vector<8x32xf32>
    %cst_14 = arith.constant dense<0.000000e+00> : vector<8x96xf32>
    %30 = tpu.matmul %29, %0, %cst_14 {dimension_numbers = #tpu.dot_dimension_numbers<[1], [0], [0], [1], [0, 0, 1, 1], [], []>} : vector<8x32xf32>, vector<32x96xf32>, vector<8x96xf32> -> vector<8x96xf32>
    %31 = vector.shape_cast %2 : vector<96xf32> to vector<1x96xf32>
    %32 = vector.broadcast %31 : vector<1x96xf32> to vector<8x96xf32>
    %33 = arith.addf %30, %32 : vector<8x96xf32>
    %34 = vector.extract_strided_slice %33 {offsets = [0, 0], sizes = [8, 8], strides = [1, 1]} : vector<8x96xf32> to vector<8x8xf32>
    %35 = vector.extract_strided_slice %33 {offsets = [0, 32], sizes = [8, 8], strides = [1, 1]} : vector<8x96xf32> to vector<8x8xf32>
    %36 = vector.extract_strided_slice %33 {offsets = [0, 64], sizes = [8, 8], strides = [1, 1]} : vector<8x96xf32> to vector<8x8xf32>
    %cst_15 = arith.constant dense<0.000000e+00> : vector<8x8xf32>
    %37 = tpu.matmul %34, %35, %cst_15 {dimension_numbers = #tpu.dot_dimension_numbers<[1], [1], [0], [0], [0, 0, 1, 0], [], []>} : vector<8x8xf32>, vector<8x8xf32>, vector<8x8xf32> -> vector<8x8xf32>
    %cst_16 = arith.constant dense<0xFF800000> : vector<8xf32>
    %38 = vector.multi_reduction <maximumf>, %37, %cst_16 [1] : vector<8x8xf32> to vector<8xf32>
    %39 = vector.shape_cast %38 : vector<8xf32> to vector<8x1xf32>
    %40 = vector.broadcast %39 : vector<8x1xf32> to vector<8x8xf32>
    %41 = arith.subf %37, %40 : vector<8x8xf32>
    %42 = math.exp %41 : vector<8x8xf32>
    %cst_17 = arith.constant dense<0.000000e+00> : vector<8xf32>
    %43 = vector.multi_reduction <add>, %42, %cst_17 [1] : vector<8x8xf32> to vector<8xf32>
    %44 = vector.shape_cast %43 : vector<8xf32> to vector<8x1xf32>
    %45 = tpu.reciprocal %44 {approx = true} : vector<8x1xf32> -> vector<8x1xf32>
    %cst_18 = arith.constant dense<0.000000e+00> : vector<8x8xf32>
    %46 = tpu.matmul %42, %36, %cst_18 {dimension_numbers = #tpu.dot_dimension_numbers<[1], [0], [0], [1], [0, 0, 1, 1], [], []>} : vector<8x8xf32>, vector<8x8xf32>, vector<8x8xf32> -> vector<8x8xf32>
    %47 = vector.broadcast %45 : vector<8x1xf32> to vector<8x8xf32>
    %48 = arith.mulf %46, %47 : vector<8x8xf32>
    %cst_19 = arith.constant dense<0.000000e+00> : vector<8x32xf32>
    %49 = tpu.matmul %48, %6, %cst_19 {dimension_numbers = #tpu.dot_dimension_numbers<[1], [0], [0], [1], [0, 0, 1, 1], [], []>} : vector<8x8xf32>, vector<8x32xf32>, vector<8x32xf32> -> vector<8x32xf32>
    %50 = vector.extract_strided_slice %33 {offsets = [0, 8], sizes = [8, 8], strides = [1, 1]} : vector<8x96xf32> to vector<8x8xf32>
    %51 = vector.extract_strided_slice %33 {offsets = [0, 40], sizes = [8, 8], strides = [1, 1]} : vector<8x96xf32> to vector<8x8xf32>
    %52 = vector.extract_strided_slice %33 {offsets = [0, 72], sizes = [8, 8], strides = [1, 1]} : vector<8x96xf32> to vector<8x8xf32>
    %cst_20 = arith.constant dense<0.000000e+00> : vector<8x8xf32>
    %53 = tpu.matmul %50, %51, %cst_20 {dimension_numbers = #tpu.dot_dimension_numbers<[1], [1], [0], [0], [0, 0, 1, 0], [], []>} : vector<8x8xf32>, vector<8x8xf32>, vector<8x8xf32> -> vector<8x8xf32>
    %cst_21 = arith.constant dense<0xFF800000> : vector<8xf32>
    %54 = vector.multi_reduction <maximumf>, %53, %cst_21 [1] : vector<8x8xf32> to vector<8xf32>
    %55 = vector.shape_cast %54 : vector<8xf32> to vector<8x1xf32>
    %56 = vector.broadcast %55 : vector<8x1xf32> to vector<8x8xf32>
    %57 = arith.subf %53, %56 : vector<8x8xf32>
    %58 = math.exp %57 : vector<8x8xf32>
    %cst_22 = arith.constant dense<0.000000e+00> : vector<8xf32>
    %59 = vector.multi_reduction <add>, %58, %cst_22 [1] : vector<8x8xf32> to vector<8xf32>
    %60 = vector.shape_cast %59 : vector<8xf32> to vector<8x1xf32>
    %61 = tpu.reciprocal %60 {approx = true} : vector<8x1xf32> -> vector<8x1xf32>
    %cst_23 = arith.constant dense<0.000000e+00> : vector<8x8xf32>
    %62 = tpu.matmul %58, %52, %cst_23 {dimension_numbers = #tpu.dot_dimension_numbers<[1], [0], [0], [1], [0, 0, 1, 1], [], []>} : vector<8x8xf32>, vector<8x8xf32>, vector<8x8xf32> -> vector<8x8xf32>
    %63 = vector.broadcast %61 : vector<8x1xf32> to vector<8x8xf32>
    %64 = arith.mulf %62, %63 : vector<8x8xf32>
    %cst_24 = arith.constant dense<0.000000e+00> : vector<8x32xf32>
    %65 = tpu.matmul %64, %7, %cst_24 {dimension_numbers = #tpu.dot_dimension_numbers<[1], [0], [0], [1], [0, 0, 1, 1], [], []>} : vector<8x8xf32>, vector<8x32xf32>, vector<8x32xf32> -> vector<8x32xf32>
    %66 = arith.addf %49, %65 : vector<8x32xf32>
    %67 = vector.extract_strided_slice %33 {offsets = [0, 16], sizes = [8, 8], strides = [1, 1]} : vector<8x96xf32> to vector<8x8xf32>
    %68 = vector.extract_strided_slice %33 {offsets = [0, 48], sizes = [8, 8], strides = [1, 1]} : vector<8x96xf32> to vector<8x8xf32>
    %69 = vector.extract_strided_slice %33 {offsets = [0, 80], sizes = [8, 8], strides = [1, 1]} : vector<8x96xf32> to vector<8x8xf32>
    %cst_25 = arith.constant dense<0.000000e+00> : vector<8x8xf32>
    %70 = tpu.matmul %67, %68, %cst_25 {dimension_numbers = #tpu.dot_dimension_numbers<[1], [1], [0], [0], [0, 0, 1, 0], [], []>} : vector<8x8xf32>, vector<8x8xf32>, vector<8x8xf32> -> vector<8x8xf32>
    %cst_26 = arith.constant dense<0xFF800000> : vector<8xf32>
    %71 = vector.multi_reduction <maximumf>, %70, %cst_26 [1] : vector<8x8xf32> to vector<8xf32>
    %72 = vector.shape_cast %71 : vector<8xf32> to vector<8x1xf32>
    %73 = vector.broadcast %72 : vector<8x1xf32> to vector<8x8xf32>
    %74 = arith.subf %70, %73 : vector<8x8xf32>
    %75 = math.exp %74 : vector<8x8xf32>
    %cst_27 = arith.constant dense<0.000000e+00> : vector<8xf32>
    %76 = vector.multi_reduction <add>, %75, %cst_27 [1] : vector<8x8xf32> to vector<8xf32>
    %77 = vector.shape_cast %76 : vector<8xf32> to vector<8x1xf32>
    %78 = tpu.reciprocal %77 {approx = true} : vector<8x1xf32> -> vector<8x1xf32>
    %cst_28 = arith.constant dense<0.000000e+00> : vector<8x8xf32>
    %79 = tpu.matmul %75, %69, %cst_28 {dimension_numbers = #tpu.dot_dimension_numbers<[1], [0], [0], [1], [0, 0, 1, 1], [], []>} : vector<8x8xf32>, vector<8x8xf32>, vector<8x8xf32> -> vector<8x8xf32>
    %80 = vector.broadcast %78 : vector<8x1xf32> to vector<8x8xf32>
    %81 = arith.mulf %79, %80 : vector<8x8xf32>
    %cst_29 = arith.constant dense<0.000000e+00> : vector<8x32xf32>
    %82 = tpu.matmul %81, %8, %cst_29 {dimension_numbers = #tpu.dot_dimension_numbers<[1], [0], [0], [1], [0, 0, 1, 1], [], []>} : vector<8x8xf32>, vector<8x32xf32>, vector<8x32xf32> -> vector<8x32xf32>
    %83 = arith.addf %66, %82 : vector<8x32xf32>
    %84 = vector.extract_strided_slice %33 {offsets = [0, 24], sizes = [8, 8], strides = [1, 1]} : vector<8x96xf32> to vector<8x8xf32>
    %85 = vector.extract_strided_slice %33 {offsets = [0, 56], sizes = [8, 8], strides = [1, 1]} : vector<8x96xf32> to vector<8x8xf32>
    %86 = vector.extract_strided_slice %33 {offsets = [0, 88], sizes = [8, 8], strides = [1, 1]} : vector<8x96xf32> to vector<8x8xf32>
    %cst_30 = arith.constant dense<0.000000e+00> : vector<8x8xf32>
    %87 = tpu.matmul %84, %85, %cst_30 {dimension_numbers = #tpu.dot_dimension_numbers<[1], [1], [0], [0], [0, 0, 1, 0], [], []>} : vector<8x8xf32>, vector<8x8xf32>, vector<8x8xf32> -> vector<8x8xf32>
    %cst_31 = arith.constant dense<0xFF800000> : vector<8xf32>
    %88 = vector.multi_reduction <maximumf>, %87, %cst_31 [1] : vector<8x8xf32> to vector<8xf32>
    %89 = vector.shape_cast %88 : vector<8xf32> to vector<8x1xf32>
    %90 = vector.broadcast %89 : vector<8x1xf32> to vector<8x8xf32>
    %91 = arith.subf %87, %90 : vector<8x8xf32>
    %92 = math.exp %91 : vector<8x8xf32>
    %cst_32 = arith.constant dense<0.000000e+00> : vector<8xf32>
    %93 = vector.multi_reduction <add>, %92, %cst_32 [1] : vector<8x8xf32> to vector<8xf32>
    %94 = vector.shape_cast %93 : vector<8xf32> to vector<8x1xf32>
    %95 = tpu.reciprocal %94 {approx = true} : vector<8x1xf32> -> vector<8x1xf32>
    %cst_33 = arith.constant dense<0.000000e+00> : vector<8x8xf32>
    %96 = tpu.matmul %92, %86, %cst_33 {dimension_numbers = #tpu.dot_dimension_numbers<[1], [0], [0], [1], [0, 0, 1, 1], [], []>} : vector<8x8xf32>, vector<8x8xf32>, vector<8x8xf32> -> vector<8x8xf32>
    %97 = vector.broadcast %95 : vector<8x1xf32> to vector<8x8xf32>
    %98 = arith.mulf %96, %97 : vector<8x8xf32>
    %cst_34 = arith.constant dense<0.000000e+00> : vector<8x32xf32>
    %99 = tpu.matmul %98, %9, %cst_34 {dimension_numbers = #tpu.dot_dimension_numbers<[1], [0], [0], [1], [0, 0, 1, 1], [], []>} : vector<8x8xf32>, vector<8x32xf32>, vector<8x32xf32> -> vector<8x32xf32>
    %100 = arith.addf %83, %99 : vector<8x32xf32>
    %101 = vector.shape_cast %5 : vector<32xf32> to vector<1x32xf32>
    %102 = vector.broadcast %101 : vector<1x32xf32> to vector<8x32xf32>
    %103 = arith.addf %100, %102 : vector<8x32xf32>
    %c0_35 = arith.constant 0 : index
    %c0_36 = arith.constant 0 : index
    %c0_37 = arith.constant 0 : index
    %104 = vector.load %arg6[%c0_35, %c0_36, %c0_37] : memref<1x8x32xf32, #tpu.memory_space<vmem>>, vector<1x8x32xf32>
    %105 = vector.shape_cast %104 : vector<1x8x32xf32> to vector<8x32xf32>
    %106 = vector.shape_cast %103 : vector<8x32xf32> to vector<1x8x32xf32>
    tpu.vector_store %arg6[%c0_35, %c0_36, %c0_37], %106 {strides = array<i32>} : memref<1x8x32xf32, #tpu.memory_space<vmem>>, vector<1x8x32xf32>,
    return
  }
  func.func @transform_0(%arg0: i32) -> (i32, i32, i32) {
    %c0_i32 = arith.constant 0 : i32
    %c0_i32_0 = arith.constant 0 : i32
    %c0_i32_1 = arith.constant 0 : i32
    return %arg0, %c0_i32, %c0_i32_0 : i32, i32, i32
  }
  func.func @transform_1(%arg0: i32) -> (i32, i32) {
    %c0_i32 = arith.constant 0 : i32
    %c0_i32_0 = arith.constant 0 : i32
    %c0_i32_1 = arith.constant 0 : i32
    return %c0_i32, %c0_i32_0 : i32, i32
  }
  func.func @transform_2(%arg0: i32) -> (i32, i32) {
    %c0_i32 = arith.constant 0 : i32
    %c0_i32_0 = arith.constant 0 : i32
    %c0_i32_1 = arith.constant 0 : i32
    return %c0_i32, %c0_i32_0 : i32, i32
  }
  func.func @transform_3(%arg0: i32) -> (i32, i32) {
    %c0_i32 = arith.constant 0 : i32
    %c0_i32_0 = arith.constant 0 : i32
    %c0_i32_1 = arith.constant 0 : i32
    return %c0_i32, %c0_i32_0 : i32, i32
  }
  func.func @transform_4(%arg0: i32) -> (i32, i32) {
    %c0_i32 = arith.constant 0 : i32
    %c0_i32_0 = arith.constant 0 : i32
    %c0_i32_1 = arith.constant 0 : i32
    return %c0_i32, %c0_i32_0 : i32, i32
  }
  func.func @transform_5(%arg0: i32) -> (i32, i32, i32) {
    %c0_i32 = arith.constant 0 : i32
    %c0_i32_0 = arith.constant 0 : i32
    %c0_i32_1 = arith.constant 0 : i32
    return %arg0, %c0_i32, %c0_i32_0 : i32, i32, i32
  }
}

</mosaic_0001>

<bundles_post_ra>
// kernel: tpu_custom_call.1
= control target key start
LH: loop header
LB: loop body
LE: loop exit
PB: predicated region body
PF: predicated region fallthrough
CT: control target
= control target key end

     0   :  { %10 = vsyncpa [#allocation3], 0  ;;  %s2208_s0 = inlined_call_operand.hbm [shape: f32[2,8,32], index: 0, kind: input, shape index: {}]   ;;  %s2209_s1 = inlined_call_operand.hbm [shape: f32[32,96], index: 1, kind: input, shape index: {}]   ;;  %s2210_s2 = inlined_call_operand.vmem [shape: f32[1,96], index: 2, kind: input, shape index: {}]   ;;  %s2211_s3 = inlined_call_operand.hbm [shape: f32[32,32], index: 3, kind: input, shape index: {}]   ;;  %s2212_s4 = inlined_call_operand.vmem [shape: f32[1,32], index: 4, kind: input, shape index: {}]   ;;  %s2213_s5 = inlined_call_operand.hbm [shape: f32[2,8,32], index: 5, kind: output, shape index: {}]  }
   0x1   :  { %12 = vsyncpa [#allocation3 + $0x1], 0 }
   0x2   :  { %13 = vsyncpa [#allocation6], 0 }
   0x3   :  { %14 = vsyncpa [#allocation4], 0 }
   0x4   :  { %16 = vsyncpa [#allocation4 + $0x1], 0  ;;  %s1889_s18 = smov 0   ;;  %s1891_s19 = smov 0  }
   0x5   :  { %s1893_s20 = smov 0   ;;  %s1895_s21 = smov 0  }
   0x6 LB: > { %s1910_s22 = sadd.s32 4294967295, %s1837_s21   ;;  %s1439_s23 = sadd.s32 4294967294, %s1837_s21   ;;  %s1837_s21 = sphi %s1895_s21, %s2233_s21   ;;  %s1833_s20 = sphi %s1893_s20, %s2232_s20   ;;  %s1829_s19 = sphi %s1891_s19, %s2231_s19   ;;  %s1825_s18 = sphi %s1889_s18, %s2230_s18  }
   0x7   : > { %p42_p0 = scmp.ne.s32.totalorder %s1829_s19, %s1825_s18  ;;  %p2214_p1 = scmp.eq.s32.totalorder %s1910_s22, 0 }
   0x8   : > { %p156_p3 = scmp.eq.s32.totalorder %s1439_s23, 1  ;;  %p1440_p5 = scmp.ge.s32.totalorder %s1837_s21, 1 }
   0x9   : > { %p1919_p4 = por %p2214_p1, %p42_p0  ;;  %p163_p7 = scmp.lt.s32.totalorder %s1837_s21, 3 }
   0xa   : > { %p1924_p6 = por %p156_p3, %p42_p0  ;;  %s1839_s27 = smov [#allocation5]  }
   0xb   : > { %s2217_s24 = scalar_select %p1919_p4, 1, 0 }
   0xc   : > { %s2218_s25 = scalar_select %p1924_p6, 1, 0 }
   0xd   : > { %p1929_p8 = pnand %p1440_p5, %p163_p7  ;;  %s175_s28 = sshll.u32 %s1839_s27, 4  ;;  %s1933_s28 = int_to_ptr.vmem [resolvable:$true] %s175_s28 }
   0xe   : > { %s1840_s30 = smov [#allocation7]   ;;  %s1681_s9 = scalar_lea.hbm %s2209_s1, 512 }
   0xf   : > { %p1592_p9 = pneg %p1929_p8  ;;  %s191_s6 = sshll.u32 %s1840_s30, 4  ;;  %s1944_s6 = int_to_ptr.vmem [resolvable:$true] %s191_s6 }
  0x10   : > { %p1682_p12 = scmp.ne.s32.totalorder %s2209_s1, %s1681_s9  ;;  %p1688_p5 = scmp.lt.u32.totalorder %s1681_s9, %s2209_s1 }
  0x11   : > { %p1940_p11 = pnand %p1592_p9, %p2214_p1 }
  0x13   : > { %p1683_p13 = pneg %p1940_p11 }
  0x15   : > { %p1684_p0 = pnand %p1683_p13, %p1682_p12 }
  0x17   : > { %p1685_p3 = pneg %p1684_p0 }
  0x19   : > { %p1690_p7 = pnand %p1688_p5, %p1685_p3 }
  0x1b   : > { %1693 = shalt.err (!%p1690_p7)
}
  0x1c   : > { %s1694_s14 = scalar_lea.vmem %s1933_s28, 512  ;;  %p1702_p2 = scmp.lt.s32.totalorder %s1933_s28, %s1933_s28 }
  0x1d   : > { %p1695_p9 = scmp.ne.s32.totalorder %s1933_s28, %s1694_s14  ;;  %p1703_p12 = scmp.lt.s32.totalorder %s1694_s14, %s1694_s14 }
  0x1f   : > { %p1697_p10 = pnand %p1695_p9, %p1683_p13  ;;  %p1704_p0 = por %p1703_p12, %p1702_p2 }
  0x21   : > { %p1698_p1 = pneg %p1697_p10 }
  0x23   : > { %p1705_p6 = pnand %p1704_p0, %p1698_p1 }
  0x25   : > { %1708 = shalt.err (!%p1705_p6)
}
  0x26   : > { %s1841_s15 = smov 128   ;;  %s1842_s16 = smov 8  }
  0x27   : > { %1595 = dma.hbm_to_vmem [thread:$0]  (!%p1940_p11), %s2209_s1, 512, %s1933_s28, [#allocation6], %s1841_s15, %s1841_s15, %s1842_s16  }
  0x28   : > { %s1709_s7 = scalar_lea.hbm %s2211_s3, 512 }
  0x29   : > { %p1710_p2 = scmp.ne.s32.totalorder %s2211_s3, %s1709_s7  ;;  %p1716_p10 = scmp.lt.u32.totalorder %s1709_s7, %s2211_s3 }
  0x2b   : > { %p1712_p1 = pnand %p1710_p2, %p1683_p13 }
  0x2d   : > { %p1713_p6 = pneg %p1712_p1 }
  0x2f   : > { %p1718_p3 = pnand %p1716_p10, %p1713_p6 }
  0x31   : > { %1721 = shalt.err (!%p1718_p3)
}
  0x32   : > { %s1722_s28 = scalar_lea.vmem %s1944_s6, 512  ;;  %p1730_p12 = scmp.lt.s32.totalorder %s1944_s6, %s1944_s6 }
  0x33   : > { %p1723_p5 = scmp.ne.s32.totalorder %s1944_s6, %s1722_s28  ;;  %p1731_p0 = scmp.lt.s32.totalorder %s1722_s28, %s1722_s28 }
  0x35   : > { %p1725_p7 = pnand %p1723_p5, %p1683_p13  ;;  %p1732_p2 = por %p1731_p0, %p1730_p12 }
  0x37   : > { %p1726_p9 = pneg %p1725_p7 }
  0x39   : > { %p1733_p1 = pnand %p1732_p2, %p1726_p9 }
  0x3b   : > { %1736 = shalt.err (!%p1733_p1)
}
  0x3c   : > { %1598 = dma.hbm_to_vmem [thread:$0]  (!%p1940_p11), %s2211_s3, 512, %s1944_s6, [#allocation6], %s1841_s15, %s1841_s15, %s1842_s16  }
  0x3d   : > { %s1999_s14 = sadd.s32 1, %s1837_s21   ;;  %s29_s29 = sadd.s32 1, %s1833_s20 }
  0x3e   : > { %s26_s17 = ssub.s32 %s1837_s21, %s1999_s14  ;;  %p36_p13 = scmp.ne.s32.totalorder %s1833_s20, %s1829_s19 }
  0x3f   : > { %p27_p6 = scmp.eq.s32.totalorder %s26_s17, 0  ;;  %p37_p10 = scmp.eq.s32.totalorder %s1837_s21, 0 }
  0x40   : > { %p2221_p3 = scmp.eq.s32.totalorder %s1910_s22, 1  ;;  %p1609_p7 = scmp.lt.s32.totalorder %s1837_s21, 2 }
  0x41   : > { %s2015_s27 = scalar_select %p27_p6, %s1833_s20, %s29_s29  }
  0x42   : > { %p2009_p5 = por %p2221_p3, %p36_p13  ;;  %p38_p9 = por %p37_p10, %p36_p13 }
  0x43   : > { %s208_s30 = sand.u32 1, %s1833_s20   ;;  %s1445_s6 = sshll.u32 %s1837_s21, 7 }
  0x44   : > { %s2222_s23 = scalar_select %p2009_p5, 1, 0 }
  0x45   : > { %s1444_s7 = sshll.u32 %s208_s30, 3  ;;  %s2022_s8 = scalar_lea.hbm %s2208_s0, %s1445_s6 }
  0x46   : > { %s212_s9 = scalar_lea.vmem [#allocation2], %s1444_s7  ;;  %p2026_p11 = pnand %p1609_p7, %p38_p9 }
  0x47   : > { %s219_s10 = sshll.u32 %s212_s9, 4  ;;  %s209_s28 = scalar_lea.sflag [#allocation3], %s208_s30  ;;  %s2024_s10 = int_to_ptr.vmem [resolvable:$true] %s219_s10 }
  0x48   : > { %s1737_s12 = scalar_lea.hbm %s2022_s8, 128  ;;  %p1739_p0 = pneg %p2026_p11 }
  0x49   : > { %p1738_p12 = scmp.ne.s32.totalorder %s2022_s8, %s1737_s12  ;;  %s1742_s17 = scalar_lea.hbm %s2208_s0, 256 }
  0x4a   : > { %p1743_p13 = scmp.lt.u32.totalorder %s2022_s8, %s2208_s0  ;;  %p1744_p6 = scmp.lt.u32.totalorder %s1742_s17, %s1737_s12 }
  0x4b   : > { %p1740_p2 = pnand %p1739_p0, %p1738_p12  ;;  %p1746_p3 = scmp.lt.u32.totalorder %s1737_s12, %s2022_s8 }
  0x4c   : > { %p1745_p10 = por %p1744_p6, %p1743_p13 }
  0x4d   : > { %p1741_p1 = pneg %p1740_p2 }
  0x4e   : > { %p1747_p7 = por %p1746_p3, %p1745_p10 }
  0x50   : > { %p1748_p9 = pnand %p1747_p7, %p1741_p1 }
  0x52   : > { %1751 = shalt.err (!%p1748_p9)
}
  0x53   : > { %s1752_s30 = scalar_lea.vmem %s2024_s10, 128  ;;  %s1843_s15 = smov [#allocation2]  }
  0x54   : > { %p1753_p12 = scmp.ne.s32.totalorder %s2024_s10, %s1752_s30  ;;  %s1757_s16 = sshll.u32 %s1843_s15, 4  ;;  %s1758_s16 = int_to_ptr.vmem [resolvable:$false] %s1757_s16 }
  0x55   : > { %s1759_s9 = scalar_lea.vmem %s1758_s16, 256  ;;  %p1760_p4 = scmp.lt.s32.totalorder %s2024_s10, %s1758_s16 }
  0x56   : > { %p1755_p2 = pnand %p1753_p12, %p1739_p0  ;;  %p1761_p13 = scmp.lt.s32.totalorder %s1759_s9, %s1752_s30 }
  0x58   : > { %p1756_p5 = pneg %p1755_p2  ;;  %p1762_p6 = por %p1761_p13, %p1760_p4 }
  0x5a   : > { %p1763_p10 = pnand %p1762_p6, %p1756_p5 }
  0x5c   : > { %1766 = shalt.err (!%p1763_p10)
}
  0x5d   : > { %1602 = dma.hbm_to_vmem [thread:$0]  (!%p2026_p11), %s2022_s8, 128, %s2024_s10, %s209_s28  }
  0x5e   : > { %228 = sbr.rel (%p1929_p8) target bundleno = 2527 (0x9df), region = 40  ;;  %s2058_s12 = sand.u32 (!%p1929_p8), 1, %s1829_s19  }
  0x5f   : > { %s1447_s13 = sshll.u32 (!%p1929_p8), %s2058_s12, 3  ;;  %s231_s29 = scalar_lea.sflag (!%p1929_p8), [#allocation3], %s2058_s12 }
  0x60   : > { %s234_s17 = scalar_lea.vmem (!%p1929_p8), [#allocation2], %s1447_s13  ;;  %p2224_p4 = scmp.ne.s32.totalorder (!%p1929_p8), %s2217_s24, 0 }
  0x65   : > { %1812 = dma.done.wait (%p2224_p4), %s231_s29, 128  }
  0x66   : > { %1814 = vsyncadd (%p2224_p4), %s231_s29, 4294967168  ;;  %p2225_p5 = scmp.eq.s32.totalorder %s1910_s22, 0 }
  0x68   : > { %1816 = dma.done.wait (%p2225_p5), [#allocation6], 1024   ;;  %p2226_p8 = pmov %p2225_p5 }
  0x69   : > { %vm280_vm0 = vcmask 261120   ;;  %v279_v0 = vld [vmem:[%s234_s17] sm:$0xff]  ;;  %v269_v7 = vld [vmem:[#allocation5] sm:$0xff]  ;;  %v270_v8 = vld [vmem:[#allocation5 + $0x8] sm:$0xff]  ;;  %v1844_v10 = vmov 0.0|0.0   ;;  %vm1845_vm1 = vmmov 0  }
  0x6a   : > { %1818 = vsyncadd (%p2226_p8), [#allocation6], 4294966272  ;;  %v281_v1 = vsel %vm280_vm0, %v279_v0, 0.0  ;;  %v271_v9 = vld [vmem:[#allocation5 + $0x10] sm:$0xff]  ;;  %1574 = vmatprep.subr.bf16.mxu0 %v1844_v10  ;;  %v1575_v11 = vpack.c.bf16 %v270_v8, %v269_v7  ;;  %v272_v12 = vld [vmem:[#allocation5 + $0x18] sm:$0xff]  ;;  %v1846_v13 = vmov 0.0  }
  0x6b   : > { %282 = vadd.xlane.f32.xlu0 %v281_v1  ;;  %1511 = vmatprep.mubr.msk.f32.mxu0 %vm1845_vm1, %v1846_v13  ;;  %v1578_v14 = vpack.c.bf16 %v272_v12, %v271_v9  ;;  %v1451_v20 = vld [vmem:[%s2210_s2] ss:$0 sm:$0xff]  ;;  %s1847_s8 = smov 120   ;;  %s1848_s10 = smov 96   ;;  %vm377_vm2 = vcmask 64512   ;;  %v275_v45 = vld [vmem:[#allocation7 + $0x8] sm:$0xff] }
  0x6c   : > { %1514 = vmatprep.subr.mxu1 %v1846_v13  ;;  %1516 = vmatprep.mubr.msk.f32.mxu1 %vm1845_vm1, %v1846_v13  ;;  %s1849_s11 = smov 88   ;;  %s1850_s28 = smov 64   ;;  %v274_v46 = vld [vmem:[#allocation7] sm:$0xff] }
  0x6d   : > { %1576 = vmatpush3.bf16.msra.mxu0 %v1575_v11  ;;  %s1851_s7 = smov 56   ;;  %s1852_s6 = smov 80   ;;  %v276_v11 = vld [vmem:[#allocation7 + $0x10] sm:$0xff] }
  0x6e   : > { %1577 = vmatprep.subr.bf16.mxu0 %v1844_v10  ;;  %s1853_s30 = smov 112   ;;  %s1854_s15 = smov 48  }
  0x6f   : > { %s1855_s16 = smov 104   ;;  %s1856_s9 = smov 72  }
  0x70   : > { %s1857_s29 = smov 40   ;;  %s1471_s26 = sshll.u32 %s1910_s22, 7 }
  0x71   : > { %1579 = vmatpush3.bf16.msra.mxu0 %v1578_v14  ;;  %p2227_p0 = scmp.ne.s32.totalorder %s2222_s23, 0 }
  0x72   : > { %1524 = vmatprep.subr.mxu0 %v1846_v13 }
  0xf8   : > { %v283_v2 = vpop.xlane.xlu0 %282 }
  0xf9   : > { %v285_v3 = vmul.f32 0.03125, %v283_v2 }
  0xfb   : > { %v286_v4 = vsub.f32 %v279_v0, %v285_v3 }
  0xfd   : > { %v287_v5 = vmul.f32 %v286_v4, %v286_v4 }
  0xff   : > { %v288_v6 = vsel %vm280_vm0, %v287_v5, 0.0 }
 0x100   : > { %289 = vadd.xlane.f32.xlu0 %v288_v6 }
 0x18d   : > { %v290_v15 = vpop.xlane.xlu0 %289 }
 0x18e   : > { %v291_v16 = vmul.f32 0.03125, %v290_v15 }
 0x190   : > { %v292_v17 = vadd.f32 1e-05, %v291_v16 }
 0x192   : > { %1663 = vrsqrt.f32 %v292_v17 }
 0x19c   : > { %v1664_v18 = vpop.eup %1663 }
 0x19d   : > { %v294_v19 = vmul.f32 %v1664_v18, %v286_v4 }
 0x19f   : > { %1512 = vmatmul.mubr.msk.f32.vlgmr.msra.gmra.mrb[0].mxu0 %vm280_vm0, %v294_v19 }
 0x1a0   : > { %1526 = vmatprep.mubr.msk.f32.mxu0 %vm1845_vm1, %v1846_v13 }
 0x272   : > { %v370_v21 = vpop.f32.mrb[0].mxu0 }
 0x273   : > { %v2086_v22 = vadd.f32 %v1451_v20, %v370_v21  ;;  %v1513_v23 = vpop.f32.mrb[1].mxu0 }
 0x275   : > { %539 = vrot.lane.b32.xlu0 %v2086_v22, %s1847_s8  ;;  %375 = vrot.lane.b32.xlu1 %v2086_v22, %s1848_s10  ;;  %s268_s8 = scalar_lea.vmem [#allocation8], %s1447_s13  ;;  %s1858_s13 = smov [#allocation8]  }
 0x276   : > { %s1350_s10 = sshll.u32 %s268_s8, 4  ;;  %s2165_s10 = int_to_ptr.vmem [resolvable:$true] %s1350_s10 }
 0x277   : > { %s1767_s22 = scalar_lea.vmem %s2165_s10, 128 }
 0x278   : > { %p1768_p11 = scmp.ne.s32.totalorder %s2165_s10, %s1767_s22 }
 0x279   : > { %541 = vrot.lane.b32.xlu1 %v2086_v22, %s1849_s11 }
 0x27a   : > { %p1769_p1 = pnand %p1768_p11, %p2227_p0 }
 0x27c   : > { %p1770_p3 = pneg %p1769_p1 }
 0x2e7   : > { %v376_v24 = vpop.permute.xlu1 %375  ;;  %v540_v26 = vpop.permute.xlu0 %539 }
 0x2e8   : > { %1515 = vmatpush3.xpose.msk.msra.mxu1 %vm377_vm2, %v376_v24 }
 0x2e9   : > { %1519 = vmatprep.subr.mxu1 %v1846_v13 }
 0x2eb   : > { %1517 = vmatmul.mubr.msk.f32.vlgmr.msra.gmra.mrb[0].mxu1 %vm377_vm2, %v2086_v22  ;;  %v542_v25 = vpop.permute.xlu1 %541 }
 0x2ec   : > { %1525 = vmatpush3.xpose.msk.msra.mxu0 %vm377_vm2, %v542_v25  ;;  %1521 = vmatprep.mubr.msk.f32.mxu1 %vm1845_vm1, %v1846_v13 }
 0x2ed   : > { %1534 = vmatprep.subr.mxu0 %v1846_v13 }
 0x2ef   : > { %1527 = vmatmul.mubr.msk.f32.vlgmr.msra.gmra.mrb[2].mxu0 %vm377_vm2, %v540_v26 }
 0x2f0   : > { %1536 = vmatprep.mubr.msk.f32.mxu0 %vm1845_vm1, %v1846_v13  ;;  %1535 = vmatpush3.msra.mxu0 %v275_v45 }
 0x2f1   : > { %1544 = vmatprep.subr.mxu0 %v1846_v13 }
 0x3be   : > { %v448_v27 = vpop.f32.mrb[0].mxu1 }
 0x3bf   : > { %v1518_v28 = vpop.f32.mrb[1].mxu1  ;;  %v452_v29 = vsel %vm377_vm2, %v448_v27, -inf }
 0x3c0   : > { %453 = vmax.xlane.f32.xlu1 %v452_v29 }
 0x3c2   : > { %v613_v30 = vpop.f32.mrb[2].mxu0 }
 0x3c3   : > { %v1528_v31 = vpop.f32.mrb[3].mxu0  ;;  %v617_v32 = vsel %vm377_vm2, %v613_v30, -inf }
 0x3c4   : > { %618 = vmax.xlane.f32.xlu0 %v617_v32 }
 0x3d1   : > { %462 = vrot.lane.b32.xlu1 %v2086_v22, %s1850_s28 }
 0x3da   : > { %627 = vrot.lane.b32.xlu0 %v2086_v22, %s1851_s7  ;;  %s2163_s7 = scalar_lea.hbm %s2213_s5, %s1471_s26 }
 0x3de   : > { %852 = vrot.lane.b32.xlu0 %v2086_v22, %s1852_s6  ;;  %s1337_s6 = scalar_lea.sflag [#allocation4], %s2058_s12 }
 0x3e2   : > { %850 = vrot.lane.b32.xlu0 %v2086_v22, %s1853_s30  ;;  %s1771_s30 = sshll.u32 %s1858_s13, 4  ;;  %s1772_s30 = int_to_ptr.vmem [resolvable:$false] %s1771_s30 }
 0x3e3   : > { %p1774_p7 = scmp.lt.s32.totalorder %s2165_s10, %s1772_s30 }
 0x44d   : > { %v454_v33 = vpop.xlane.xlu1 %453 }
 0x44e   : > { %v455_v34 = vsub.f32 %v448_v27, %v454_v33 }
 0x450   : > { %v456_v35 = vmul.f32 1.442695, %v455_v34 }
 0x451   : > { %v463_v36 = vpop.permute.xlu1 %462  ;;  %v619_v37 = vpop.xlane.xlu0 %618 }
 0x452   : > { %1665 = vpow2.f32 %v456_v35  ;;  %v620_v38 = vsub.f32 %v613_v30, %v619_v37  ;;  %1520 = vmatpush3.msra.mxu1 %v463_v36  ;;  %v1469_v35 = vld [vmem:[%s2212_s4] ss:$0 sm:$0xff] }
 0x453   : > { %1529 = vmatprep.subr.mxu1 %v1846_v13 }
 0x454   : > { %v621_v39 = vmul.f32 1.442695, %v620_v38 }
 0x455   : > { %v628_v41 = vpop.permute.xlu0 %627 }
 0x456   : > { %1667 = vpow2.f32 %v621_v39 }
 0x459   : > { %v853_v47 = vpop.permute.xlu0 %852 }
 0x45c   : > { %v1666_v40 = vpop.eup %1665 }
 0x45d   : > { %1522 = vmatmul.mubr.msk.f32.vlgmr.msra.gmra.mrb[2].mxu1 %vm377_vm2, %v1666_v40  ;;  %v458_v42 = vsel %vm377_vm2, %v1666_v40, 0.0  ;;  %v851_v48 = vpop.permute.xlu0 %850 }
 0x45e   : > { %1530 = vmatpush3.msra.mxu1 %v628_v41  ;;  %459 = vadd.xlane.f32.xlu0 %v458_v42 }
 0x45f   : > { %1531 = vmatprep.mubr.msk.f32.mxu1 %vm1845_vm1, %v1846_v13  ;;  %1539 = vmatprep.subr.mxu1 %v1846_v13 }
 0x460   : > { %v1668_v43 = vpop.eup %1667 }
 0x461   : > { %1532 = vmatmul.mubr.msk.f32.vlgmr.msra.gmra.mrb[4].mxu1 %vm377_vm2, %v1668_v43  ;;  %v623_v44 = vsel %vm377_vm2, %v1668_v43, 0.0 }
 0x462   : > { %624 = vadd.xlane.f32.xlu1 %v623_v44  ;;  %1541 = vmatprep.mubr.msk.f32.mxu1 %vm1845_vm1, %v1846_v13 }
 0x463   : > { %1540 = vmatpush3.msra.mxu1 %v274_v46 }
 0x464   : > { %1549 = vmatprep.subr.mxu1 %v1846_v13 }
 0x473   : > { %938 = vrot.lane.b32.xlu1 %v2086_v22, %s1854_s15  ;;  %s1773_s15 = scalar_lea.vmem %s1772_s30, 256 }
 0x474   : > { %1089 = vrot.lane.b32.xlu0 %v2086_v22, %s1855_s16  ;;  %p1775_p9 = scmp.lt.s32.totalorder %s1773_s15, %s1767_s22 }
 0x476   : > { %p1776_p12 = por %p1775_p9, %p1774_p7 }
 0x478   : > { %p1777_p2 = pnand %p1776_p12, %p1770_p3 }
 0x4eb   : > { %v460_v49 = vpop.xlane.xlu0 %459 }
 0x4ec   : > { %1669 = vrcp.f32 %v460_v49 }
 0x4ef   : > { %v625_v50 = vpop.xlane.xlu1 %624  ;;  %v1090_v10 = vpop.permute.xlu0 %1089 }
 0x4f0   : > { %1671 = vrcp.f32 %v625_v50 }
 0x4f3   : > { %v939_v55 = vpop.permute.xlu1 %938 }
 0x4f6   : > { %v1670_v51 = vpop.eup %1669 }
 0x4fa   : > { %v1672_v56 = vpop.eup %1671 }
 0x530   : > { %v534_v52 = vpop.f32.mrb[2].mxu1 }
 0x531   : > { %v538_v53 = vmul.f32 %v1670_v51, %v534_v52  ;;  %v1523_v54 = vpop.f32.mrb[3].mxu1 }
 0x533   : > { %1542 = vmatmul.mubr.msk.f32.vlgmr.msra.gmra.mrb[6].mxu1 %vm377_vm2, %v538_v53 }
 0x534   : > { %1550 = vmatpush3.msra.mxu1 %v939_v55  ;;  %v699_v57 = vpop.f32.mrb[4].mxu1  ;;  %1551 = vmatprep.mubr.msk.f32.mxu1 %vm1845_vm1, %v1846_v13 }
 0x535   : > { %v703_v58 = vmul.f32 %v1672_v56, %v699_v57  ;;  %v1533_v59 = vpop.f32.mrb[5].mxu1  ;;  %1559 = vmatprep.subr.mxu1 %v1846_v13 }
 0x537   : > { %1537 = vmatmul.mubr.msk.f32.vlgmr.msra.gmra.mrb[4].mxu0 %vm377_vm2, %v703_v58 }
 0x538   : > { %1545 = vmatpush3.xpose.msk.msra.mxu0 %vm377_vm2, %v853_v47  ;;  %1546 = vmatprep.mubr.msk.f32.mxu0 %vm1845_vm1, %v1846_v13 }
 0x539   : > { %1554 = vmatprep.subr.mxu0 %v1846_v13 }
 0x53b   : > { %1547 = vmatmul.mubr.msk.f32.vlgmr.msra.gmra.mrb[6].mxu0 %vm377_vm2, %v851_v48 }
 0x53c   : > { %1556 = vmatprep.mubr.msk.f32.mxu0 %vm1845_vm1, %v1846_v13  ;;  %1555 = vmatpush3.msra.mxu0 %v276_v11 }
 0x53d   : > { %1564 = vmatprep.subr.mxu0 %v1846_v13 }
 0x606   : > { %v846_v60 = vpop.f32.mrb[6].mxu1 }
 0x607   : > { %v1543_v61 = vpop.f32.mrb[7].mxu1 }
 0x60a   : > { %v773_v62 = vpop.f32.mrb[4].mxu0 }
 0x60b   : > { %v847_v63 = vadd.f32 %v846_v60, %v773_v62  ;;  %v1538_v0 = vpop.f32.mrb[5].mxu0 }
 0x60e   : > { %v924_v1 = vpop.f32.mrb[6].mxu0 }
 0x60f   : > { %v1548_v2 = vpop.f32.mrb[7].mxu0  ;;  %v928_v3 = vsel %vm377_vm2, %v924_v1, -inf }
 0x610   : > { %929 = vmax.xlane.f32.xlu1 %v928_v3 }
 0x621   : > { %1091 = vrot.lane.b32.xlu1 %v2086_v22, %s1856_s9 }
 0x69d   : > { %v930_v4 = vpop.xlane.xlu1 %929 }
 0x69e   : > { %v931_v5 = vsub.f32 %v924_v1, %v930_v4 }
 0x6a0   : > { %v932_v6 = vmul.f32 1.442695, %v931_v5 }
 0x6a1   : > { %v1092_v8 = vpop.permute.xlu1 %1091 }
 0x6a2   : > { %1673 = vpow2.f32 %v932_v6 }
 0x6ac   : > { %v1674_v7 = vpop.eup %1673 }
 0x6ad   : > { %1552 = vmatmul.mubr.msk.f32.vlgmr.msra.gmra.mrb[8].mxu1 %vm377_vm2, %v1674_v7  ;;  %v934_v9 = vsel %vm377_vm2, %v1674_v7, 0.0 }
 0x6ae   : > { %1560 = vmatpush3.xpose.msk.msra.mxu1 %vm377_vm2, %v1092_v8  ;;  %935 = vadd.xlane.f32.xlu1 %v934_v9 }
 0x6af   : > { %1561 = vmatprep.mubr.msk.f32.mxu1 %vm1845_vm1, %v1846_v13  ;;  %1569 = vmatprep.subr.mxu1 %v1846_v13 }
 0x6b1   : > { %1562 = vmatmul.mubr.msk.f32.vlgmr.msra.gmra.mrb[10].mxu1 %vm377_vm2, %v1090_v10 }
 0x6b2   : > { %1571 = vmatprep.mubr.msk.f32.mxu1 %vm1845_vm1, %v1846_v13 }
 0x6bf   : > { %1177 = vrot.lane.b32.xlu1 %v2086_v22, %s1857_s29 }
 0x73b   : > { %v936_v12 = vpop.xlane.xlu1 %935 }
 0x73c   : > { %1675 = vrcp.f32 %v936_v12 }
 0x73f   : > { %v1178_v18 = vpop.permute.xlu1 %1177 }
 0x746   : > { %v1676_v14 = vpop.eup %1675 }
 0x780   : > { %v1010_v15 = vpop.f32.mrb[8].mxu1 }
 0x781   : > { %v1014_v16 = vmul.f32 %v1676_v14, %v1010_v15  ;;  %v1553_v17 = vpop.f32.mrb[9].mxu1 }
 0x783   : > { %1557 = vmatmul.mubr.msk.f32.vlgmr.msra.gmra.mrb[8].mxu0 %vm377_vm2, %v1014_v16 }
 0x784   : > { %1565 = vmatpush3.msra.mxu0 %v1178_v18  ;;  %v1163_v19 = vpop.f32.mrb[10].mxu1  ;;  %1566 = vmatprep.mubr.msk.f32.mxu0 %vm1845_vm1, %v1846_v13  ;;  %v277_v13 = vld [vmem:[#allocation7 + $0x18] sm:$0xff] }
 0x785   : > { %v1563_v20 = vpop.f32.mrb[11].mxu1  ;;  %v1167_v21 = vsel %vm377_vm2, %v1163_v19, -inf  ;;  %1570 = vmatpush3.msra.mxu1 %v277_v13 }
 0x786   : > { %1168 = vmax.xlane.f32.xlu0 %v1167_v21 }
 0x813   : > { %v1169_v22 = vpop.xlane.xlu0 %1168 }
 0x814   : > { %v1170_v23 = vsub.f32 %v1163_v19, %v1169_v22 }
 0x816   : > { %v1171_v24 = vmul.f32 1.442695, %v1170_v23 }
 0x818   : > { %1677 = vpow2.f32 %v1171_v24 }
 0x822   : > { %v1678_v25 = vpop.eup %1677 }
 0x823   : > { %1567 = vmatmul.mubr.msk.f32.vlgmr.msra.gmra.mrb[10].mxu0 %vm377_vm2, %v1678_v25  ;;  %v1173_v26 = vsel %vm377_vm2, %v1678_v25, 0.0 }
 0x824   : > { %1174 = vadd.xlane.f32.xlu0 %v1173_v26 }
 0x856   : > { %v1084_v27 = vpop.f32.mrb[8].mxu0 }
 0x857   : > { %v1088_v28 = vadd.f32 %v1084_v27, %v847_v63  ;;  %v1558_v29 = vpop.f32.mrb[9].mxu0 }
 0x8b1   : > { %v1175_v30 = vpop.xlane.xlu0 %1174 }
 0x8b2   : > { %1679 = vrcp.f32 %v1175_v30 }
 0x8bc   : > { %v1680_v31 = vpop.eup %1679 }
 0x8f6   : > { %v1249_v32 = vpop.f32.mrb[10].mxu0 }
 0x8f7   : > { %v1253_v33 = vmul.f32 %v1680_v31, %v1249_v32  ;;  %v1568_v34 = vpop.f32.mrb[11].mxu0 }
 0x8f9   : > { %1572 = vmatmul.mubr.msk.f32.vlgmr.msra.gmra.mrb[12].mxu1 %vm377_vm2, %v1253_v33 }
 0x9cc   : > { %v1323_v36 = vpop.f32.mrb[12].mxu1 }
 0x9cd   : > { %v1327_v37 = vadd.f32 %v1323_v36, %v1088_v28  ;;  %v1573_v38 = vpop.f32.mrb[13].mxu1 }
 0x9cf   : > { %v1334_v39 = vadd.f32 %v1469_v35, %v1327_v37 }
 0x9d1   : > { %1335 = vst.msk [vmem:[%s268_s8] sm:$0xff] %vm280_vm0, %v1334_v39 }
 0x9d2   : > { %1780 = shalt.err (!%p1777_p2)
}
 0x9d3   : > { %s1781_s12 = scalar_lea.hbm %s2163_s7, 128  ;;  %s1785_s29 = scalar_lea.hbm %s2213_s5, 256 }
 0x9d4   : > { %p1782_p13 = scmp.ne.s32.totalorder %s2163_s7, %s1781_s12  ;;  %p1786_p4 = scmp.lt.u32.totalorder %s2163_s7, %s2213_s5 }
 0x9d5   : > { %p1787_p5 = scmp.lt.u32.totalorder %s1785_s29, %s1781_s12  ;;  %p1789_p11 = scmp.lt.u32.totalorder %s1781_s12, %s2163_s7 }
 0x9d6   : > { %p1783_p6 = pnand %p1782_p13, %p2227_p0 }
 0x9d7   : > { %p1788_p8 = por %p1787_p5, %p1786_p4 }
 0x9d8   : > { %p1784_p10 = pneg %p1783_p6 }
 0x9d9   : > { %p1790_p1 = por %p1789_p11, %p1788_p8 }
 0x9db   : > { %p1791_p3 = pnand %p1790_p1, %p1784_p10 }
 0x9dd   : > { %1794 = shalt.err (!%p1791_p3)
}
 0x9de   : > { %1590 = dma.vmem_to_hbm [thread:$0]  (%p2227_p0), %s2165_s10, 128, %s2163_s7, %s1337_s6  }
 0x9df PF: > { %s1362_s26 = sand.u32 1, %s1825_s18   ;;  %p2228_p7 = scmp.ne.s32.totalorder %s2218_s25, 0 }
 0x9e0   : > { %p2229_p9 = scmp.ge.s32.totalorder %s1837_s21, 2  ;;  %s1363_s8 = scalar_lea.sflag [#allocation4], %s1362_s26 }
 0x9e2   : > { %p1604_p12 = pnand %p2229_p9, %p2228_p7 }
 0x9e4   : > { %1820 = dma.done.wait (!%p1604_p12), %s1363_s8, 128  }
 0x9e5   : > { %1822 = vsyncadd (!%p1604_p12), %s1363_s8, 4294967168  ;;  %p19_p2 = scmp.ge.s32.totalorder %s1999_s14, 4   ;;  %s2230_s18 = smov %s1829_s19 }
 0x9e6   : > { %s2231_s19 = smov %s1833_s20  ;;  %s2232_s20 = smov %s2015_s27 }
 0x9e7   : > { %s2233_s21 = smov %s1999_s14  ;;  %21 = sbr.rel (!%p19_p2) target bundleno = 6 (0x6), region = 93 }
 0x9ee   :  { %1368 = vsyncpa [#allocation3], 1 }
 0x9ef   :  { %1370 = vsyncpa [#allocation3 + $0x1], 1 }
 0x9f0   :  { %1371 = vsyncpa [#allocation6], 1 }
 0x9f1   :  { %1372 = vsyncpa [#allocation4], 1 }
 0x9f2   :  { %1374 = vsyncpa [#allocation4 + $0x1], 1 }

</bundles_post_ra>
